<compile_context>
chip_gen: v7x
topology: tpu7x:2x2x1
jax: 0.10.0
libtpu: 0.0.40
codegen_flags: <defaults>
</compile_context>

<pallas_src>
import functools
import math

import jax
import jax.numpy as jnp
from jax.experimental import pallas as pl
from jax.experimental.pallas import tpu as pltpu

_TM, _TN, _TK = 256, 256, 1024  # default tiles (shrunk automatically for small dims)


def _round_up(x, m):
    return ((x + m - 1) // m) * m


def _maybe_cast(a, dtype):
    return a if a.dtype == dtype else a.astype(dtype)


def _maybe_pad(a, target_shape):
    if tuple(a.shape) == tuple(target_shape):
        return a
    pads = [(0, t - s) for s, t in zip(a.shape, target_shape)]
    return jnp.pad(a, pads)


def _nk_tiles(out_dim, in_dim, tn, tk):
    # Keep tn/tk multiples of 128 (lane-dense stores, aligned MXU feeds) while
    # shrinking for small problems.
    tn = min(tn, _round_up(out_dim, 128))
    tk = min(tk, _round_up(in_dim, 128))
    return tn, tk


def prepare_weight(weight, *, tn=_TN, tk=_TK, mxu_dtype=jnp.bfloat16):
    """One-time weight layout for equal_linear.

    Transposes the PyTorch (out_dim, in_dim) weight to (in_dim, out_dim) so the
    kernel runs a plain (tk, tn) contraction (no per-step transpose of the
    weight tile), pads to tile multiples once (instead of per call), and casts
    to the MXU feed dtype (bf16 by default: halves HBM weight traffic).
    Pass the result to equal_linear(..., w_prepared=...) in hot loops.
    """
    out_dim, in_dim = weight.shape
    tn, tk = _nk_tiles(out_dim, in_dim, tn, tk)
    Np, Kp = _round_up(out_dim, tn), _round_up(in_dim, tk)
    w_kn = jnp.transpose(weight)              # (in_dim, out_dim), done once
    w_kn = _maybe_pad(w_kn, (Kp, Np))
    return _maybe_cast(w_kn, mxu_dtype)


def _equal_linear_kernel(x_ref, w_ref, *refs, scale, use_activation):
    # x_ref: (tm, tk)  mxu dtype
    # w_ref: (tk, tn)  mxu dtype (pre-transposed weight)
    # b_ref: (1, tn)   f32 == bias * lr_mul   (absent in the activation path)
    # o_ref: (tm, tn)  f32, resident across the K axis (block index ignores k)
    if use_activation:
        (o_ref,) = refs
        b_ref = None
    else:
        b_ref, o_ref = refs

    k = pl.program_id(2)
    prod = jnp.dot(x_ref[...], w_ref[...], preferred_element_type=jnp.float32)

    @pl.when(k == 0)
    def _first():
        o_ref[...] = prod                      # no zero-fill, no scratch copy

    @pl.when(k != 0)
    def _accumulate():
        o_ref[...] += prod

    @pl.when(k == pl.num_programs(2) - 1)
    def _finalize():
        acc = o_ref[...]
        if use_activation:
            # leaky_relu(scale * acc, 0.2) * 1.4 folded into one select + mul;
            # branch on the static sign of `scale` so the fold stays exact.
            if scale >= 0.0:
                pos, neg = 1.4 * scale, 0.2 * 1.4 * scale
            else:
                pos, neg = 0.2 * 1.4 * scale, 1.4 * scale
            o_ref[...] = acc * jnp.where(acc >= 0.0, jnp.float32(pos),
                                         jnp.float32(neg))
        else:
            o_ref[...] = acc * jnp.float32(scale) + b_ref[...]


def equal_linear(x, weight, bias=None, *, lr_mul=1.0, activation=None,
                 tm=_TM, tn=_TN, tk=_TK, mxu_dtype=jnp.bfloat16,
                 w_prepared=None):
    """Pallas implementation of EqualLinear.forward.

    x:      (B, in_dim)
    weight: (out_dim, in_dim) float32 (PyTorch nn.Linear layout)
    bias:   (out_dim,) or None (unused when `activation` is truthy)
    w_prepared: optional result of prepare_weight(weight, tn=tn, tk=tk,
                mxu_dtype=mxu_dtype) to skip the per-call transpose/pad/cast.
    """
    B, in_dim = x.shape
    out_dim, in_dim_w = weight.shape
    assert in_dim == in_dim_w, (in_dim, in_dim_w)
    scale = 1.0 / math.sqrt(in_dim) * lr_mul
    use_activation = bool(activation)

    tn, tk = _nk_tiles(out_dim, in_dim, tn, tk)
    tm = min(tm, _round_up(B, 8))
    Mp, Np, Kp = _round_up(B, tm), _round_up(out_dim, tn), _round_up(in_dim, tk)

    if w_prepared is None:
        w_prepared = prepare_weight(weight, tn=tn, tk=tk, mxu_dtype=mxu_dtype)
    assert w_prepared.shape == (Kp, Np), (w_prepared.shape, (Kp, Np))
    assert w_prepared.dtype == jnp.dtype(mxu_dtype)

    # x padding is cheap (small batch); cast to the MXU feed dtype here so the
    # HBM->VMEM stream is already narrow.
    x_p = _maybe_pad(_maybe_cast(x, mxu_dtype), (Mp, Kp))

    in_specs = [
        pl.BlockSpec((tm, tk), lambda i, j, k: (i, k)),   # x
        # NOTE: if profiling shows exposed weight DMA for skinny tm, add
        # pipeline_mode=pl.Buffered(3) here and re-check the VMEM budget.
        pl.BlockSpec((tk, tn), lambda i, j, k: (k, j)),   # W^T (pre-transposed)
    ]
    operands = [x_p, w_prepared]
    if not use_activation:
        if bias is None:
            bias = jnp.zeros((out_dim,), jnp.float32)
        # Fold lr_mul into the bias on the host (module adds bias * lr_mul).
        b_p = _maybe_pad(
            (_maybe_cast(bias, jnp.float32) * jnp.float32(lr_mul)
             ).reshape(1, out_dim), (1, Np))
        in_specs.append(pl.BlockSpec((1, tn), lambda i, j, k: (0, j)))
        operands.append(b_p)

    # VMEM budget: double-buffered x/W tiles + resident f32 output tile (+bias).
    itemsize = jnp.dtype(mxu_dtype).itemsize
    est = (2 * (tm * tk + tk * tn) * itemsize + 2 * tm * tn * 4
           + (0 if use_activation else 2 * tn * 4))
    cp_kwargs = dict(dimension_semantics=("parallel", "parallel", "arbitrary"))
    if est > 12 * 1024 * 1024:
        # Only raise the scoped limit when needed; stay under v7x's 64 MiB.
        cp_kwargs["vmem_limit_bytes"] = min(2 * est, 60 * 1024 * 1024)

    grid = (Mp // tm, Np // tn, Kp // tk)
    kernel = functools.partial(_equal_linear_kernel, scale=scale,
                               use_activation=use_activation)

    out_p = pl.pallas_call(
        kernel,
        out_shape=jax.ShapeDtypeStruct((Mp, Np), jnp.float32),
        grid_spec=pltpu.PrefetchScalarGridSpec(
            num_scalar_prefetch=0,
            grid=grid,
            in_specs=in_specs,
            out_specs=pl.BlockSpec((tm, tn), lambda i, j, k: (i, j)),
        ),
        compiler_params=pltpu.CompilerParams(**cp_kwargs),
    )(*operands)

    if (Mp, Np) != (B, out_dim):
        out_p = out_p[:B, :out_dim]
    return out_p


def _reference(x, weight, bias, *, lr_mul=1.0, activation=None, feed_dtype=None):
    """Pure-JAX reference. feed_dtype mimics the kernel's MXU input rounding."""
    if feed_dtype is not None:
        x = x.astype(feed_dtype).astype(jnp.float32)
        weight = weight.astype(feed_dtype).astype(jnp.float32)
    scale = 1.0 / math.sqrt(weight.shape[1]) * lr_mul
    out = (x @ weight.T) * scale
    if activation:
        out = jnp.where(out >= 0.0, out, 0.2 * out) * 1.4
    else:
        out = out + bias * lr_mul
    return out


if __name__ == "__main__":
    key = jax.random.PRNGKey(0)
    k_x, k_w, k_x2, k_w2 = jax.random.split(key, 4)

    # --- Test 1: small shapes matching the module defaults -------------------
    batch, in_dim, out_dim = 8, 32, 64
    lr_mul = 1.0
    weight = jax.random.normal(k_w, (out_dim, in_dim), jnp.float32) / lr_mul
    bias = jnp.full((out_dim,), 0.0, jnp.float32)
    x = jax.random.normal(k_x, (batch, in_dim), jnp.float32)

    # f32 MXU feed: exact structural parity with the f32 reference.
    out_lin32 = jax.block_until_ready(
        equal_linear(x, weight, bias, lr_mul=lr_mul, activation=None,
                     mxu_dtype=jnp.float32))
    ref_lin = _reference(x, weight, bias, lr_mul=lr_mul, activation=None)
    assert out_lin32.shape == (batch, out_dim)
    assert jnp.allclose(out_lin32, ref_lin, atol=1e-4, rtol=1e-4)

    out_act32 = jax.block_until_ready(
        equal_linear(x, weight, bias, lr_mul=lr_mul, activation="fused_lrelu",
                     mxu_dtype=jnp.float32))
    ref_act = _reference(x, weight, bias, lr_mul=lr_mul, activation="fused_lrelu")
    assert jnp.allclose(out_act32, ref_act, atol=1e-4, rtol=1e-4)

    # Default bf16 MXU feed: compare against a reference using the same bf16
    # inputs (f32 accumulation), plus a loose check against pure f32 math.
    out_lin = jax.block_until_ready(
        equal_linear(x, weight, bias, lr_mul=lr_mul, activation=None))
    ref_lin_bf16 = _reference(x, weight, bias, lr_mul=lr_mul, activation=None,
                              feed_dtype=jnp.bfloat16)
    assert jnp.allclose(out_lin, ref_lin_bf16, atol=1e-3, rtol=1e-3)
    assert jnp.allclose(out_lin, ref_lin, atol=1e-1, rtol=1e-1)

    out_act = jax.block_until_ready(
        equal_linear(x, weight, bias, lr_mul=lr_mul, activation="fused_lrelu"))
    ref_act_bf16 = _reference(x, weight, bias, lr_mul=lr_mul,
                              activation="fused_lrelu", feed_dtype=jnp.bfloat16)
    assert jnp.allclose(out_act, ref_act_bf16, atol=1e-3, rtol=1e-3)

    # --- Test 2: non-multiple dims + small forced tiles to exercise the
    # (M, N, K) grid, in-place K accumulation, padding/slicing and the
    # one-time prepared-weight path. ------------------------------------------
    b2, k2, n2 = 48, 384, 320
    lr_mul2 = 0.5
    w2 = jax.random.normal(k_w2, (n2, k2), jnp.float32) / lr_mul2
    bias2 = jnp.full((n2,), 0.1, jnp.float32)
    x2 = jax.random.normal(k_x2, (b2, k2), jnp.float32)

    w2_prep = prepare_weight(w2, tn=128, tk=128, mxu_dtype=jnp.bfloat16)
    out2 = jax.block_until_ready(
        equal_linear(x2, w2, bias2, lr_mul=lr_mul2, activation=None,
                     tm=16, tn=128, tk=128, w_prepared=w2_prep))   # grid (3,3,3)
    ref2_bf16 = _reference(x2, w2, bias2, lr_mul=lr_mul2, activation=None,
                           feed_dtype=jnp.bfloat16)
    assert out2.shape == (b2, n2)
    assert jnp.allclose(out2, ref2_bf16, atol=2e-3, rtol=2e-3)

    out2a = jax.block_until_ready(
        equal_linear(x2, w2, bias2, lr_mul=lr_mul2, activation="fused_lrelu",
                     tm=16, tn=128, tk=128, mxu_dtype=jnp.float32))
    ref2a = _reference(x2, w2, bias2, lr_mul=lr_mul2, activation="fused_lrelu")
    assert jnp.allclose(out2a, ref2a, atol=1e-3, rtol=1e-4)

    print("KERNEL_OK")
</pallas_src>

<mosaic_0001>
module attributes {stable_mosaic.version = 11 : i64} {
  func.func @_equal_linear_kernel(%arg0: i32, %arg1: i32, %arg2: i32, %arg3: memref<8x128xf32, #tpu.memory_space<vmem>>, %arg4: memref<128x128xf32, #tpu.memory_space<vmem>>, %arg5: memref<1x128xf32, #tpu.memory_space<vmem>>, %arg6: memref<8x128xf32, #tpu.memory_space<vmem>>) attributes {dimension_semantics = [#tpu.dimension_semantics<parallel>, #tpu.dimension_semantics<parallel>, #tpu.dimension_semantics<arbitrary>], iteration_bounds = array<i64: 1, 1, 1>, scalar_prefetch = 0 : i64, scratch_operands = 0 : i64, tpu.core_type = #tpu.core_type<tc>, window_params = [{transform_indices = @transform_0, window_bounds = array<i64: 8, 128>}, {transform_indices = @transform_1, window_bounds = array<i64: 128, 128>}, {transform_indices = @transform_2, window_bounds = array<i64: 1, 128>}, {transform_indices = @transform_3, window_bounds = array<i64: 8, 128>}]} {
    %c0 = arith.constant 0 : index
    %c0_0 = arith.constant 0 : index
    %0 = vector.load %arg3[%c0, %c0_0] : memref<8x128xf32, #tpu.memory_space<vmem>>, vector<8x128xf32>
    %c0_1 = arith.constant 0 : index
    %c0_2 = arith.constant 0 : index
    %1 = vector.load %arg4[%c0_1, %c0_2] : memref<128x128xf32, #tpu.memory_space<vmem>>, vector<128x128xf32>
    %cst = arith.constant dense<0.000000e+00> : vector<8x128xf32>
    %2 = tpu.matmul %0, %1, %cst {dimension_numbers = #tpu.dot_dimension_numbers<[1], [0], [0], [1], [0, 0, 1, 1], [], []>} : vector<8x128xf32>, vector<128x128xf32>, vector<8x128xf32> -> vector<8x128xf32>
    %c0_i32 = arith.constant 0 : i32
    %3 = arith.cmpi eq, %arg2, %c0_i32 : i32
    %4 = arith.extui %3 : i1 to i32
    %c0_i32_3 = arith.constant 0 : i32
    %5 = arith.cmpi ne, %4, %c0_i32_3 : i32
    scf.if %5 {
      %c0_8 = arith.constant 0 : index
      %c0_9 = arith.constant 0 : index
      %12 = vector.load %arg6[%c0_8, %c0_9] : memref<8x128xf32, #tpu.memory_space<vmem>>, vector<8x128xf32>
      tpu.vector_store %arg6[%c0_8, %c0_9], %2 {strides = array<i32>} : memref<8x128xf32, #tpu.memory_space<vmem>>, vector<8x128xf32>,
    } else {
    }
    %c0_i32_4 = arith.constant 0 : i32
    %6 = arith.cmpi ne, %arg2, %c0_i32_4 : i32
    %7 = arith.extui %6 : i1 to i32
    %c0_i32_5 = arith.constant 0 : i32
    %8 = arith.cmpi ne, %7, %c0_i32_5 : i32
    scf.if %8 {
      %c0_8 = arith.constant 0 : index
      %c0_9 = arith.constant 0 : index
      %12 = vector.load %arg6[%c0_8, %c0_9] : memref<8x128xf32, #tpu.memory_space<vmem>>, vector<8x128xf32>
      %13 = arith.addf %12, %2 : vector<8x128xf32>
      %c0_10 = arith.constant 0 : index
      %c0_11 = arith.constant 0 : index
      %14 = vector.load %arg6[%c0_10, %c0_11] : memref<8x128xf32, #tpu.memory_space<vmem>>, vector<8x128xf32>
      tpu.vector_store %arg6[%c0_10, %c0_11], %13 {strides = array<i32>} : memref<8x128xf32, #tpu.memory_space<vmem>>, vector<8x128xf32>,
    } else {
    }
    %c0_i32_6 = arith.constant 0 : i32
    %9 = arith.cmpi eq, %arg2, %c0_i32_6 : i32
    %10 = arith.extui %9 : i1 to i32
    %c0_i32_7 = arith.constant 0 : i32
    %11 = arith.cmpi ne, %10, %c0_i32_7 : i32
    scf.if %11 {
      %c0_8 = arith.constant 0 : index
      %c0_9 = arith.constant 0 : index
      %12 = vector.load %arg6[%c0_8, %c0_9] : memref<8x128xf32, #tpu.memory_space<vmem>>, vector<8x128xf32>
      %cst_10 = arith.constant 0.176776692 : f32
      %13 = vector.broadcast %cst_10 : f32 to vector<8x128xf32>
      %14 = arith.mulf %12, %13 : vector<8x128xf32>
      %c0_11 = arith.constant 0 : index
      %c0_12 = arith.constant 0 : index
      %15 = vector.load %arg5[%c0_11, %c0_12] : memref<1x128xf32, #tpu.memory_space<vmem>>, vector<1x128xf32>
      %16 = vector.broadcast %15 : vector<1x128xf32> to vector<8x128xf32>
      %17 = arith.addf %14, %16 : vector<8x128xf32>
      %c0_13 = arith.constant 0 : index
      %c0_14 = arith.constant 0 : index
      %18 = vector.load %arg6[%c0_13, %c0_14] : memref<8x128xf32, #tpu.memory_space<vmem>>, vector<8x128xf32>
      tpu.vector_store %arg6[%c0_13, %c0_14], %17 {strides = array<i32>} : memref<8x128xf32, #tpu.memory_space<vmem>>, vector<8x128xf32>,
    } else {
    }
    return
  }
  func.func @transform_0(%arg0: i32, %arg1: i32, %arg2: i32) -> (i32, i32) {
    %c0_i32 = arith.constant 0 : i32
    return %arg0, %arg2 : i32, i32
  }
  func.func @transform_1(%arg0: i32, %arg1: i32, %arg2: i32) -> (i32, i32) {
    %c0_i32 = arith.constant 0 : i32
    return %arg2, %arg1 : i32, i32
  }
  func.func @transform_2(%arg0: i32, %arg1: i32, %arg2: i32) -> (i32, i32) {
    %c0_i32 = arith.constant 0 : i32
    %c0_i32_0 = arith.constant 0 : i32
    return %c0_i32, %arg1 : i32, i32
  }
  func.func @transform_3(%arg0: i32, %arg1: i32, %arg2: i32) -> (i32, i32) {
    %c0_i32 = arith.constant 0 : i32
    return %arg0, %arg1 : i32, i32
  }
}

</mosaic_0001>

<bundles_post_ra>
// kernel: tpu_custom_call.1
= control target key start
LH: loop header
LB: loop body
LE: loop exit
PB: predicated region body
PF: predicated region fallthrough
CT: control target
= control target key end

     0   :  { %8 = vsyncpa [#allocation3], 0  ;;  %s401_s0 = inlined_call_operand.hbm [shape: f32[8,128], index: 0, kind: input, shape index: {}]   ;;  %s402_s1 = inlined_call_operand.hbm [shape: f32[128,128], index: 1, kind: input, shape index: {}]   ;;  %s403_s2 = inlined_call_operand.vmem [shape: f32[1,128], index: 2, kind: input, shape index: {}]   ;;  %s404_s3 = inlined_call_operand.hbm [shape: f32[8,128], index: 3, kind: output, shape index: {}]  }
   0x1   :  { %9 = vsyncpa [#allocation6], 0 }
   0x2   :  { %10 = vsyncpa [#allocation4], 0  ;;  %s327_s12 = smov [#allocation2]   ;;  %s328_s14 = smov [#allocation5]  }
   0x3   :  { %s17_s13 = sshll.u32 %s327_s12, 4  ;;  %s26_s15 = sshll.u32 %s328_s14, 4  ;;  %s18_s13 = int_to_ptr.vmem [resolvable:$true] %s17_s13  ;;  %s355_s15 = int_to_ptr.vmem [resolvable:$true] %s26_s15 }
   0x4   :  { %s255_s18 = scalar_lea.hbm %s401_s0, 128 }
   0x5   :  { %p256_p0 = scmp.ne.s32.totalorder %s401_s0, %s255_s18  ;;  %p259_p1 = scmp.lt.u32.totalorder %s255_s18, %s401_s0 }
   0x7   :  { %p261_p2 = pnand %p259_p1, %p256_p0 }
   0x9   :  { %264 = shalt.err (!%p261_p2)
}
   0xa   :  { %s265_s23 = scalar_lea.vmem %s18_s13, 128  ;;  %p270_p4 = scmp.lt.s32.totalorder %s18_s13, %s18_s13 }
   0xb   :  { %p266_p3 = scmp.ne.s32.totalorder %s18_s13, %s265_s23  ;;  %p271_p5 = scmp.lt.s32.totalorder %s265_s23, %s265_s23 }
   0xd   :  { %p272_p6 = por %p271_p5, %p270_p4 }
   0xf   :  { %p273_p7 = pnand %p272_p6, %p266_p3 }
  0x11   :  { %276 = shalt.err (!%p273_p7)
}
  0x12   :  { %20 = dma.hbm_to_vmem [thread:$0]  %s401_s0, 128, %s18_s13, [#allocation3]  }
  0x13   :  { %s277_s28 = scalar_lea.hbm %s402_s1, 2048 }
  0x14   :  { %p278_p8 = scmp.ne.s32.totalorder %s402_s1, %s277_s28  ;;  %p281_p9 = scmp.lt.u32.totalorder %s277_s28, %s402_s1 }
  0x16   :  { %p283_p10 = pnand %p281_p9, %p278_p8 }
  0x18   :  { %286 = shalt.err (!%p283_p10)
}
  0x19   :  { %s287_s6 = scalar_lea.vmem %s355_s15, 2048  ;;  %p292_p12 = scmp.lt.s32.totalorder %s355_s15, %s355_s15 }
  0x1a   :  { %p288_p11 = scmp.ne.s32.totalorder %s355_s15, %s287_s6  ;;  %p293_p13 = scmp.lt.s32.totalorder %s287_s6, %s287_s6 }
  0x1c   :  { %p294_p0 = por %p293_p13, %p292_p12 }
  0x1e   :  { %p295_p1 = pnand %p294_p0, %p288_p11 }
  0x20   :  { %298 = shalt.err (!%p295_p1)
}
  0x21   :  { %s329_s0 = smov 128   ;;  %s330_s7 = smov 8  }
  0x22   :  { %32 = dma.hbm_to_vmem [thread:$0]  %s402_s1, 2048, %s355_s15, [#allocation6], %s329_s0, %s329_s0, %s330_s7  }
  0x23   :  { %321 = dma.done.wait [#allocation3], 128  }
  0x24   :  { %322 = vsyncadd [#allocation3], 4294967168 }
  0x25   :  { %323 = dma.done.wait [#allocation6], 2048  }
  0x26   :  { %324 = vsyncadd [#allocation6], 4294965248  ;;  %v331_v0 = vmov 0.0|0.0   ;;  %vm332_vm0 = vmmov 0   ;;  %v333_v1 = vmov 0.0   ;;  %v42_v2 = vld [vmem:[#allocation5] sm:$0xff] }
  0x27   :  { %223 = vmatprep.subr.bf16.mxu0 %v331_v0  ;;  %220 = vmatprep.mubr.msk.f32.mxu0 %vm332_vm0, %v333_v1  ;;  %v43_v3 = vld [vmem:[#allocation5 + $0x8] sm:$0xff]  ;;  %v44_v4 = vld [vmem:[#allocation5 + $0x10] sm:$0xff]  ;;  %v45_v6 = vld [vmem:[#allocation5 + $0x18] sm:$0xff]  ;;  %s334_s11 = smov [#allocation7]  }
  0x28   :  { %v224_v5 = vpack.c.bf16 %v43_v3, %v42_v2  ;;  %v227_v7 = vpack.c.bf16 %v45_v6, %v44_v4  ;;  %v46_v8 = vld [vmem:[#allocation5 + $0x20] sm:$0xff]  ;;  %v47_v9 = vld [vmem:[#allocation5 + $0x28] sm:$0xff]  ;;  %v48_v11 = vld [vmem:[#allocation5 + $0x30] sm:$0xff]  ;;  %s160_s12 = sshll.u32 %s334_s11, 4  ;;  %s161_s12 = int_to_ptr.vmem [resolvable:$true] %s160_s12 }
  0x29   :  { %v230_v10 = vpack.c.bf16 %v47_v9, %v46_v8  ;;  %v49_v12 = vld [vmem:[#allocation5 + $0x38] sm:$0xff]  ;;  %v50_v14 = vld [vmem:[#allocation5 + $0x40] sm:$0xff]  ;;  %v51_v15 = vld [vmem:[#allocation5 + $0x48] sm:$0xff]  ;;  %s299_s13 = scalar_lea.vmem %s161_s12, 128  ;;  %p304_p3 = scmp.lt.s32.totalorder %s161_s12, %s161_s12 }
  0x2a   :  { %225 = vmatpush3.bf16.msra.mxu0 %v224_v5  ;;  %v233_v13 = vpack.c.bf16 %v49_v12, %v48_v11  ;;  %v236_v16 = vpack.c.bf16 %v51_v15, %v50_v14  ;;  %v52_v17 = vld [vmem:[#allocation5 + $0x50] sm:$0xff]  ;;  %v53_v18 = vld [vmem:[#allocation5 + $0x58] sm:$0xff]  ;;  %v54_v20 = vld [vmem:[#allocation5 + $0x60] sm:$0xff]  ;;  %p300_p2 = scmp.ne.s32.totalorder %s161_s12, %s299_s13  ;;  %p305_p4 = scmp.lt.s32.totalorder %s299_s13, %s299_s13 }
  0x2b   :  { %226 = vmatprep.subr.bf16.mxu0 %v331_v0  ;;  %v239_v19 = vpack.c.bf16 %v53_v18, %v52_v17  ;;  %v55_v21 = vld [vmem:[#allocation5 + $0x68] sm:$0xff]  ;;  %v56_v23 = vld [vmem:[#allocation5 + $0x70] sm:$0xff]  ;;  %v57_v24 = vld [vmem:[#allocation5 + $0x78] sm:$0xff] }
  0x2c   :  { %v242_v22 = vpack.c.bf16 %v55_v21, %v54_v20  ;;  %v245_v25 = vpack.c.bf16 %v57_v24, %v56_v23  ;;  %v41_v26 = vld [vmem:[#allocation2] sm:$0xff]  ;;  %p306_p5 = por %p305_p4, %p304_p3 }
  0x2d   :  { %v170_v28 = vld [vmem:[%s403_s2] ss:$0 sm:$0xff] }
  0x2e   :  { %228 = vmatpush3.bf16.msra.mxu0 %v227_v7  ;;  %p307_p6 = pnand %p306_p5, %p300_p2 }
  0x2f   :  { %229 = vmatprep.subr.bf16.mxu0 %v331_v0 }
  0x32   :  { %231 = vmatpush3.bf16.msra.mxu0 %v230_v10 }
  0x33   :  { %232 = vmatprep.subr.bf16.mxu0 %v331_v0 }
  0x36   :  { %234 = vmatpush3.bf16.msra.mxu0 %v233_v13 }
  0x37   :  { %235 = vmatprep.subr.bf16.mxu0 %v331_v0 }
  0x3a   :  { %237 = vmatpush3.bf16.msra.mxu0 %v236_v16 }
  0x3b   :  { %238 = vmatprep.subr.bf16.mxu0 %v331_v0 }
  0x3e   :  { %240 = vmatpush3.bf16.msra.mxu0 %v239_v19 }
  0x3f   :  { %241 = vmatprep.subr.bf16.mxu0 %v331_v0 }
  0x42   :  { %243 = vmatpush3.bf16.msra.mxu0 %v242_v22 }
  0x43   :  { %244 = vmatprep.subr.bf16.mxu0 %v331_v0 }
  0x46   :  { %246 = vmatpush3.bf16.msra.mxu0 %v245_v25 }
  0x49   :  { %221 = vmatmul.mubr.f32.vlgmr.msra.gmra.mrb[0].mxu0 %v41_v26 }
 0x11c   :  { %v124_v27 = vpop.f32.mrb[0].mxu0 }
 0x11d   :  { %v222_v29 = vpop.f32.mrb[1].mxu0  ;;  %v144_v30 = vmul.f32 0.17677669, %v124_v27 }
 0x11f   :  { %v152_v31 = vadd.f32 %v170_v28, %v144_v30 }
 0x121   :  { %153 = vst [vmem:[#allocation7] sm:$0xff] %v152_v31 }
 0x122   :  { %310 = shalt.err (!%p307_p6)
}
 0x123   :  { %s311_s16 = scalar_lea.hbm %s404_s3, 128 }
 0x124   :  { %p312_p7 = scmp.ne.s32.totalorder %s404_s3, %s311_s16  ;;  %p315_p8 = scmp.lt.u32.totalorder %s311_s16, %s404_s3 }
 0x126   :  { %p317_p9 = pnand %p315_p8, %p312_p7 }
 0x128   :  { %320 = shalt.err (!%p317_p9)
}
 0x129   :  { %163 = dma.vmem_to_hbm [thread:$0]  %s161_s12, 128, %s404_s3, [#allocation4]  }
 0x12a   :  { %325 = dma.done.wait [#allocation4], 128  }
 0x12b   :  { %326 = vsyncadd [#allocation4], 4294967168 }
 0x12c   :  { %167 = vsyncpa [#allocation3], 1 }
 0x12d   :  { %168 = vsyncpa [#allocation6], 1 }
 0x12e   :  { %169 = vsyncpa [#allocation4], 1 }

</bundles_post_ra>
